<compile_context>
chip_gen: v5e
topology: v5e:2x2
jax: 0.10.0
libtpu: 0.0.40
codegen_flags: <defaults>
</compile_context>

<pallas_src>
import functools

import jax
import jax.numpy as jnp
from jax import lax
from jax.experimental import pallas as pl
from jax.experimental.pallas import tpu as pltpu


# ----------------------------- kernel --------------------------------------

def _rnn_kernel(x_ref, whh_ref, wfc_ref, bfc_ref, out_ref, h_scratch,
                *, split, unroll):
    """One (batch-block, time-block) grid step of the RNN recurrence.

    x_ref    : (Tc, Bb, Hp) bf16   pre-projected inputs (emb @ W_ih + b), time-major
    whh_ref  : (Hp, Hp)     bf16   hidden-to-hidden weight (pre-transposed)
    wfc_ref  : (1, Hp)      f32    final linear weight row (zero-padded)
    bfc_ref  : (1, 1)       f32    final linear bias (SMEM scalar)
    out_ref  : (Bb, 128)    f32    lane-dense sigmoid output slab
    h_scratch: (Bb, Hp)     f32    hidden state carried across time blocks
    """
    t_blk = pl.program_id(1)
    n_t_blk = pl.num_programs(1)
    tc, bb, _ = x_ref.shape

    # h_0 = 0 (PyTorch default when no initial hidden state is given).
    @pl.when(t_blk == 0)
    def _():
        h_scratch[...] = jnp.zeros_like(h_scratch)

    # Hoist the weight load out of the recurrent loop.
    w_hh = whh_ref[...]                                   # (Hp, Hp) bf16

    if split:
        # Two independent batch sub-chains: half A's MXU matmul overlaps
        # half B's tanh (EUP) and add/cast (VPU), hiding per-step latency.
        half = bb // 2
        h0 = (h_scratch[:half, :], h_scratch[half:, :])

        def step(t, carry):
            h_a, h_b = carry
            x_t = x_ref[t]                                # (Bb, Hp) bf16
            pre_a = x_t[:half].astype(jnp.float32) + jnp.dot(
                h_a.astype(jnp.bfloat16), w_hh,
                preferred_element_type=jnp.float32)
            pre_b = x_t[half:].astype(jnp.float32) + jnp.dot(
                h_b.astype(jnp.bfloat16), w_hh,
                preferred_element_type=jnp.float32)
            return jnp.tanh(pre_a), jnp.tanh(pre_b)

        h_a, h_b = lax.fori_loop(0, tc, step, h0, unroll=unroll)
        h_scratch[:half, :] = h_a                         # one write per chunk
        h_scratch[half:, :] = h_b
        h_parts = (h_a, h_b)
    else:
        h0 = h_scratch[...]

        def step(t, h_prev):
            # Only h_prev @ W_hh sits on the serial dependency chain.
            pre = x_ref[t].astype(jnp.float32) + jnp.dot(
                h_prev.astype(jnp.bfloat16), w_hh,
                preferred_element_type=jnp.float32)
            return jnp.tanh(pre)

        h_final = lax.fori_loop(0, tc, step, h0, unroll=unroll)
        h_scratch[...] = h_final                          # one write per chunk
        h_parts = (h_final,)

    @pl.when(t_blk == n_t_blk - 1)
    def _():
        # fc(H -> 1) as a VPU multiply + lane reduction (no N=1 MXU drain).
        w_row = wfc_ref[...]                              # (1, Hp) f32
        logit_parts = [jnp.sum(h * w_row, axis=-1, keepdims=True)
                       for h in h_parts]
        logits = (logit_parts[0] if len(logit_parts) == 1
                  else jnp.concatenate(logit_parts, axis=0)) + bfc_ref[0, 0]
        out_ref[...] = jnp.broadcast_to(jax.nn.sigmoid(logits), out_ref.shape)


# ----------------------------- blocking helpers -----------------------------

def _round_up(x, m):
    return ((x + m - 1) // m) * m


@functools.lru_cache(maxsize=1)
def _tpu_hw_info():
    """Best-effort (tensorcores_per_device, vmem_bytes_per_core)."""
    kind = ""
    try:
        kind = jax.devices()[0].device_kind.lower()
    except Exception:
        pass
    vmem = None
    try:
        vmem = int(pltpu.get_tpu_info().vmem_capacity_bytes)
    except Exception:
        vmem = None
    if "7" in kind:                         # v7x: 2 TCs/chip, 64 MiB VMEM per TC
        cores = 2
        vmem = min(vmem, 64 * 2**20) if vmem else 64 * 2**20
    elif "v4" in kind or "v5p" in kind:     # megacore: 2 TCs, 128 MiB VMEM
        cores = 2
        vmem = vmem or 128 * 2**20
    else:                                   # v5e / v6e: 1 TC, 128 MiB VMEM
        cores = 1
        vmem = vmem or 128 * 2**20
    return cores, vmem


def _batch_block(bp, n_cores):
    """Whole batch as one block on 1-TC chips; exactly 2 blocks on 2-TC chips."""
    if n_cores >= 2 and bp >= 16 and (bp // 2) % 8 == 0:
        return bp // 2
    return bp


def _time_block(t, bb, hp, vmem_cap):
    """Largest divisor of T whose double-buffered x chunk fits the VMEM budget."""
    fixed = (hp * hp * 2            # W_hh (bf16, single buffer requested)
             + bb * hp * 4          # h scratch (f32)
             + 2 * bb * 128 * 4     # output slab (double-buffered)
             + 8 * hp * 4)          # fc row (sublane-padded)
    budget = int(vmem_cap * 0.55) - fixed
    per_step = 2 * bb * hp * 2      # double-buffered bf16 x per time step
    cap = max(budget // per_step, 8)
    cap = int(min(cap, 512))
    for cand in range(min(t, cap), 0, -1):
        if t % cand == 0:
            return cand
    return 1


def _resident_spec(block_shape, index_map):
    """Grid-invariant operand: request a single pipeline buffer (saves VMEM)."""
    try:
        return pl.BlockSpec(block_shape, index_map, pipeline_mode=pl.Buffered(1))
    except Exception:  # pipeline_mode / Buffered unavailable in this jax version
        return pl.BlockSpec(block_shape, index_map)


# ----------------------------- wrapper --------------------------------------

@jax.jit
def sentiment_rnn_forward(token_ids, params):
    """token_ids: (B, T) int32.  Returns (B, 1) float32 in [0, 1]."""
    emb_table = params["embedding"]          # (V, E) f32
    w_ih = params["w_ih"]                    # (E, H) f32  (pre-transposed)
    w_hh = params["w_hh"]                    # (H, H) f32  (pre-transposed)
    b = params["b"]                          # (1, H) f32  (b_ih + b_hh)
    w_fc = params["w_fc"]                    # (H, 1) f32  (pre-transposed)
    b_fc = params["b_fc"]                    # (1, 1) f32

    B, T = token_ids.shape
    H = w_hh.shape[0]

    n_cores, vmem_cap = _tpu_hw_info()

    # Hardware-friendly padded sizes (sublane / lane dense).
    Bp = _round_up(B, 8)
    Hp = _round_up(H, 128)

    # ---- Glue (plain JAX): fold embedding + input projection + bias. ----
    # proj_table[v] = emb[v] @ W_ih + b   (zero-padded to Hp columns)
    w_ih_p = jnp.pad(w_ih, ((0, 0), (0, Hp - H)))
    b_p = jnp.pad(b, ((0, 0), (0, Hp - H)))
    proj_table = (emb_table @ w_ih_p + b_p).astype(jnp.bfloat16)      # (V, Hp)

    # Gather time-major directly: (T, B, Hp), then zero-pad batch to Bp
    # (padded rows stay exactly 0 through the recurrence since tanh(0)=0).
    x_proj = jnp.take(proj_table, token_ids.T, axis=0)                # (T, B, Hp)
    x_proj = jnp.pad(x_proj, ((0, 0), (0, Bp - B), (0, 0)))           # (T, Bp, Hp)
    # TODO(synk): nn.Embedding errors on out-of-range ids; jnp.take clamps instead.
    # (An in-kernel gather via scalar-prefetched token ids + manual DMA would cut
    #  the x_proj HBM round-trip, but per-row DMAs at these row sizes are
    #  descriptor-overhead bound, so the wrapper-side gather is kept.)

    # Zero-padded weights: padded h columns stay exactly 0.
    w_hh_p = jnp.pad(w_hh, ((0, Hp - H), (0, Hp - H))).astype(jnp.bfloat16)
    w_fc_row = jnp.pad(w_fc.reshape(1, H), ((0, 0), (0, Hp - H)))     # (1, Hp) f32

    # ---- Generation-aware blocking. ----
    Bb = _batch_block(Bp, n_cores)
    Tc = _time_block(T, Bb, Hp, vmem_cap)
    grid = (Bp // Bb, T // Tc)    # (batch [parallel], time [arbitrary, innermost])

    split = (Bb >= 16) and ((Bb // 2) % 8 == 0)
    unroll = min(Tc, 16 if (Bb <= 32 and Hp <= 512) else 8)

    est = (2 * Tc * Bb * Hp * 2   # x stream (bf16, double-buffered)
           + Hp * Hp * 2          # W_hh (single buffer)
           + 8 * Hp * 4           # fc row
           + 2 * Bb * 128 * 4     # out slab
           + Bb * Hp * 4)         # h scratch
    vmem_limit = int(min(max(est * 3 // 2, 32 * 1024 * 1024), vmem_cap * 3 // 4))

    kernel = functools.partial(_rnn_kernel, split=split, unroll=unroll)

    grid_spec = pltpu.PrefetchScalarGridSpec(
        num_scalar_prefetch=0,
        grid=grid,
        in_specs=[
            pl.BlockSpec((Tc, Bb, Hp), lambda bi, ti: (ti, bi, 0)),   # x stream
            _resident_spec((Hp, Hp), lambda bi, ti: (0, 0)),          # W_hh
            _resident_spec((1, Hp), lambda bi, ti: (0, 0)),           # W_fc row
            pl.BlockSpec(memory_space=pltpu.MemorySpace.SMEM),        # b_fc scalar
        ],
        out_specs=pl.BlockSpec((Bb, 128), lambda bi, ti: (bi, 0)),    # lane-dense
        # Per-core hidden-state scratch (each batch block / core gets its own).
        scratch_shapes=[pltpu.VMEM((Bb, Hp), jnp.float32)],
    )

    out_slab = pl.pallas_call(
        kernel,
        out_shape=jax.ShapeDtypeStruct((Bp, 128), jnp.float32),
        grid_spec=grid_spec,
        compiler_params=pltpu.CompilerParams(
            # Batch axis is independent (2-TC split on v7x); the time axis
            # carries h_scratch and MUST stay innermost and "arbitrary".
            dimension_semantics=("parallel", "arbitrary"),
            vmem_limit_bytes=vmem_limit),
    )(x_proj, w_hh_p, w_fc_row, b_fc)

    return out_slab[:B, :1]                  # (B, 1)


# ----------------------------- params / reference ---------------------------

def init_params(key, vocab_size, embed_dim, hidden_dim):
    """Deterministic synthetic init matching nn.Embedding / nn.RNN / nn.Linear shapes."""
    ks = jax.random.split(key, 7)
    bound = 1.0 / jnp.sqrt(hidden_dim)
    return {
        # nn.Embedding(vocab_size, embed_dim): N(0, 1)
        "embedding": jax.random.normal(ks[0], (vocab_size, embed_dim), jnp.float32),
        # nn.RNN(embed_dim, hidden_dim): W_ih (H, E), W_hh (H, H) — stored transposed
        "w_ih": jax.random.uniform(ks[1], (embed_dim, hidden_dim), jnp.float32,
                                   -bound, bound),
        "w_hh": jax.random.uniform(ks[2], (hidden_dim, hidden_dim), jnp.float32,
                                   -bound, bound),
        # b_ih + b_hh folded into one (1, H) bias
        "b": (jax.random.uniform(ks[3], (1, hidden_dim), jnp.float32, -bound, bound)
              + jax.random.uniform(ks[4], (1, hidden_dim), jnp.float32, -bound, bound)),
        # nn.Linear(hidden_dim, 1): weight (1, H) — stored transposed as (H, 1)
        "w_fc": jax.random.uniform(ks[5], (hidden_dim, 1), jnp.float32, -bound, bound),
        "b_fc": jax.random.uniform(ks[6], (1, 1), jnp.float32, -bound, bound),
    }


def _reference_forward(token_ids, params):
    """Pure-JAX f32 reference matching the PyTorch forward."""
    x = jnp.take(params["embedding"], token_ids, axis=0)       # (B, T, E)
    B = x.shape[0]
    H = params["w_hh"].shape[0]

    def step(h, x_t):
        h = jnp.tanh(x_t @ params["w_ih"] + h @ params["w_hh"] + params["b"])
        return h, None

    h0 = jnp.zeros((B, H), jnp.float32)
    h_n, _ = lax.scan(step, h0, jnp.transpose(x, (1, 0, 2)))
    return jax.nn.sigmoid(h_n @ params["w_fc"] + params["b_fc"])


# ----------------------------- main -----------------------------------------

if __name__ == "__main__":
    # Small shape consistent with the module: batch=2, seq=8, embed=16, hidden=32.
    vocab_size, embed_dim, hidden_dim = 64, 16, 32
    batch, seq_len = 2, 8

    key = jax.random.PRNGKey(0)
    k_params, k_tokens, k_params2, k_tokens2 = jax.random.split(key, 4)

    params = init_params(k_params, vocab_size, embed_dim, hidden_dim)
    token_ids = jax.random.randint(k_tokens, (batch, seq_len), 0, vocab_size,
                                   dtype=jnp.int32)

    out = sentiment_rnn_forward(token_ids, params)
    out = jax.block_until_ready(out)

    assert out.shape == (batch, 1)
    assert bool(jnp.all((out >= 0.0) & (out <= 1.0)))

    ref = _reference_forward(token_ids, params)
    assert bool(jnp.allclose(out, ref, atol=5e-2)), (out, ref)

    # Larger check: exercises a multi-row batch block and (on 1-TC chips) the
    # interleaved two-sub-chain recurrence path.
    params2 = init_params(k_params2, 128, 24, 96)
    token_ids2 = jax.random.randint(k_tokens2, (16, 16), 0, 128, dtype=jnp.int32)
    out2 = jax.block_until_ready(sentiment_rnn_forward(token_ids2, params2))
    ref2 = _reference_forward(token_ids2, params2)
    assert out2.shape == (16, 1)
    assert bool(jnp.allclose(out2, ref2, atol=5e-2)), (out2, ref2)

    print("KERNEL_OK")
</pallas_src>

<mosaic_0001>
module attributes {stable_mosaic.version = 11 : i64} {
  func.func @_rnn_kernel(%arg0: i32, %arg1: i32, %arg2: memref<8x8x128xbf16, #tpu.memory_space<vmem>>, %arg3: memref<128x128xbf16, #tpu.memory_space<vmem>>, %arg4: memref<1x128xf32, #tpu.memory_space<vmem>>, %arg5: memref<1x1xf32, #tpu.memory_space<smem>>, %arg6: memref<8x128xf32, #tpu.memory_space<vmem>>, %arg7: memref<8x128xf32, #tpu.memory_space<vmem>>) attributes {dimension_semantics = [#tpu.dimension_semantics<parallel>, #tpu.dimension_semantics<arbitrary>], iteration_bounds = array<i64: 1, 1>, scalar_prefetch = 0 : i64, scratch_operands = 1 : i64, tpu.core_type = #tpu.core_type<tc>, window_params = [{transform_indices = @transform_0, window_bounds = array<i64: 8, 8, 128>}, {pipeline_mode = #tpu.pipeline_mode<synchronous>, transform_indices = @transform_1, window_bounds = array<i64: 128, 128>}, {pipeline_mode = #tpu.pipeline_mode<synchronous>, transform_indices = @transform_2, window_bounds = array<i64: 1, 128>}, {transform_indices = @transform_3, window_bounds = array<i64: 1, 1>}, {transform_indices = @transform_4, window_bounds = array<i64: 8, 128>}]} {
    %c0_i32 = arith.constant 0 : i32
    %0 = arith.cmpi eq, %arg1, %c0_i32 : i32
    %1 = arith.extui %0 : i1 to i32
    %c0_i32_0 = arith.constant 0 : i32
    %2 = arith.cmpi ne, %1, %c0_i32_0 : i32
    scf.if %2 {
      %cst_32 = arith.constant 0.000000e+00 : f32
      %73 = vector.broadcast %cst_32 : f32 to vector<8x128xf32>
      %c0_33 = arith.constant 0 : index
      %c0_34 = arith.constant 0 : index
      %74 = vector.load %arg7[%c0_33, %c0_34] : memref<8x128xf32, #tpu.memory_space<vmem>>, vector<8x128xf32>
      tpu.vector_store %arg7[%c0_33, %c0_34], %73 {strides = array<i32>} : memref<8x128xf32, #tpu.memory_space<vmem>>, vector<8x128xf32>,
    } else {
    }
    %c0 = arith.constant 0 : index
    %c0_1 = arith.constant 0 : index
    %3 = vector.load %arg3[%c0, %c0_1] : memref<128x128xbf16, #tpu.memory_space<vmem>>, vector<128x128xbf16>
    %c0_2 = arith.constant 0 : index
    %c0_3 = arith.constant 0 : index
    %4 = vector.load %arg7[%c0_2, %c0_3] : memref<8x128xf32, #tpu.memory_space<vmem>>, vector<8x128xf32>
    %c0_i32_4 = arith.constant 0 : i32
    %5 = arith.index_cast %c0_i32_4 : i32 to index
    %c0_5 = arith.constant 0 : index
    %c0_6 = arith.constant 0 : index
    %6 = vector.load %arg2[%5, %c0_5, %c0_6] : memref<8x8x128xbf16, #tpu.memory_space<vmem>>, vector<1x8x128xbf16>
    %7 = vector.shape_cast %6 : vector<1x8x128xbf16> to vector<8x128xbf16>
    %8 = arith.extf %7 : vector<8x128xbf16> to vector<8x128xf32>
    %9 = arith.truncf %4 : vector<8x128xf32> to vector<8x128xbf16>
    %cst = arith.constant dense<0.000000e+00> : vector<8x128xf32>
    %10 = tpu.matmul %9, %3, %cst {dimension_numbers = #tpu.dot_dimension_numbers<[1], [0], [0], [1], [0, 0, 1, 1], [], []>} : vector<8x128xbf16>, vector<128x128xbf16>, vector<8x128xf32> -> vector<8x128xf32>
    %11 = arith.addf %8, %10 : vector<8x128xf32>
    %12 = math.tanh %11 : vector<8x128xf32>
    %c1_i32 = arith.constant 1 : i32
    %13 = arith.index_cast %c1_i32 : i32 to index
    %c0_7 = arith.constant 0 : index
    %c0_8 = arith.constant 0 : index
    %14 = vector.load %arg2[%13, %c0_7, %c0_8] : memref<8x8x128xbf16, #tpu.memory_space<vmem>>, vector<1x8x128xbf16>
    %15 = vector.shape_cast %14 : vector<1x8x128xbf16> to vector<8x128xbf16>
    %16 = arith.extf %15 : vector<8x128xbf16> to vector<8x128xf32>
    %17 = arith.truncf %12 : vector<8x128xf32> to vector<8x128xbf16>
    %cst_9 = arith.constant dense<0.000000e+00> : vector<8x128xf32>
    %18 = tpu.matmul %17, %3, %cst_9 {dimension_numbers = #tpu.dot_dimension_numbers<[1], [0], [0], [1], [0, 0, 1, 1], [], []>} : vector<8x128xbf16>, vector<128x128xbf16>, vector<8x128xf32> -> vector<8x128xf32>
    %19 = arith.addf %16, %18 : vector<8x128xf32>
    %20 = math.tanh %19 : vector<8x128xf32>
    %c2_i32 = arith.constant 2 : i32
    %21 = arith.index_cast %c2_i32 : i32 to index
    %c0_10 = arith.constant 0 : index
    %c0_11 = arith.constant 0 : index
    %22 = vector.load %arg2[%21, %c0_10, %c0_11] : memref<8x8x128xbf16, #tpu.memory_space<vmem>>, vector<1x8x128xbf16>
    %23 = vector.shape_cast %22 : vector<1x8x128xbf16> to vector<8x128xbf16>
    %24 = arith.extf %23 : vector<8x128xbf16> to vector<8x128xf32>
    %25 = arith.truncf %20 : vector<8x128xf32> to vector<8x128xbf16>
    %cst_12 = arith.constant dense<0.000000e+00> : vector<8x128xf32>
    %26 = tpu.matmul %25, %3, %cst_12 {dimension_numbers = #tpu.dot_dimension_numbers<[1], [0], [0], [1], [0, 0, 1, 1], [], []>} : vector<8x128xbf16>, vector<128x128xbf16>, vector<8x128xf32> -> vector<8x128xf32>
    %27 = arith.addf %24, %26 : vector<8x128xf32>
    %28 = math.tanh %27 : vector<8x128xf32>
    %c3_i32 = arith.constant 3 : i32
    %29 = arith.index_cast %c3_i32 : i32 to index
    %c0_13 = arith.constant 0 : index
    %c0_14 = arith.constant 0 : index
    %30 = vector.load %arg2[%29, %c0_13, %c0_14] : memref<8x8x128xbf16, #tpu.memory_space<vmem>>, vector<1x8x128xbf16>
    %31 = vector.shape_cast %30 : vector<1x8x128xbf16> to vector<8x128xbf16>
    %32 = arith.extf %31 : vector<8x128xbf16> to vector<8x128xf32>
    %33 = arith.truncf %28 : vector<8x128xf32> to vector<8x128xbf16>
    %cst_15 = arith.constant dense<0.000000e+00> : vector<8x128xf32>
    %34 = tpu.matmul %33, %3, %cst_15 {dimension_numbers = #tpu.dot_dimension_numbers<[1], [0], [0], [1], [0, 0, 1, 1], [], []>} : vector<8x128xbf16>, vector<128x128xbf16>, vector<8x128xf32> -> vector<8x128xf32>
    %35 = arith.addf %32, %34 : vector<8x128xf32>
    %36 = math.tanh %35 : vector<8x128xf32>
    %c4_i32 = arith.constant 4 : i32
    %37 = arith.index_cast %c4_i32 : i32 to index
    %c0_16 = arith.constant 0 : index
    %c0_17 = arith.constant 0 : index
    %38 = vector.load %arg2[%37, %c0_16, %c0_17] : memref<8x8x128xbf16, #tpu.memory_space<vmem>>, vector<1x8x128xbf16>
    %39 = vector.shape_cast %38 : vector<1x8x128xbf16> to vector<8x128xbf16>
    %40 = arith.extf %39 : vector<8x128xbf16> to vector<8x128xf32>
    %41 = arith.truncf %36 : vector<8x128xf32> to vector<8x128xbf16>
    %cst_18 = arith.constant dense<0.000000e+00> : vector<8x128xf32>
    %42 = tpu.matmul %41, %3, %cst_18 {dimension_numbers = #tpu.dot_dimension_numbers<[1], [0], [0], [1], [0, 0, 1, 1], [], []>} : vector<8x128xbf16>, vector<128x128xbf16>, vector<8x128xf32> -> vector<8x128xf32>
    %43 = arith.addf %40, %42 : vector<8x128xf32>
    %44 = math.tanh %43 : vector<8x128xf32>
    %c5_i32 = arith.constant 5 : i32
    %45 = arith.index_cast %c5_i32 : i32 to index
    %c0_19 = arith.constant 0 : index
    %c0_20 = arith.constant 0 : index
    %46 = vector.load %arg2[%45, %c0_19, %c0_20] : memref<8x8x128xbf16, #tpu.memory_space<vmem>>, vector<1x8x128xbf16>
    %47 = vector.shape_cast %46 : vector<1x8x128xbf16> to vector<8x128xbf16>
    %48 = arith.extf %47 : vector<8x128xbf16> to vector<8x128xf32>
    %49 = arith.truncf %44 : vector<8x128xf32> to vector<8x128xbf16>
    %cst_21 = arith.constant dense<0.000000e+00> : vector<8x128xf32>
    %50 = tpu.matmul %49, %3, %cst_21 {dimension_numbers = #tpu.dot_dimension_numbers<[1], [0], [0], [1], [0, 0, 1, 1], [], []>} : vector<8x128xbf16>, vector<128x128xbf16>, vector<8x128xf32> -> vector<8x128xf32>
    %51 = arith.addf %48, %50 : vector<8x128xf32>
    %52 = math.tanh %51 : vector<8x128xf32>
    %c6_i32 = arith.constant 6 : i32
    %53 = arith.index_cast %c6_i32 : i32 to index
    %c0_22 = arith.constant 0 : index
    %c0_23 = arith.constant 0 : index
    %54 = vector.load %arg2[%53, %c0_22, %c0_23] : memref<8x8x128xbf16, #tpu.memory_space<vmem>>, vector<1x8x128xbf16>
    %55 = vector.shape_cast %54 : vector<1x8x128xbf16> to vector<8x128xbf16>
    %56 = arith.extf %55 : vector<8x128xbf16> to vector<8x128xf32>
    %57 = arith.truncf %52 : vector<8x128xf32> to vector<8x128xbf16>
    %cst_24 = arith.constant dense<0.000000e+00> : vector<8x128xf32>
    %58 = tpu.matmul %57, %3, %cst_24 {dimension_numbers = #tpu.dot_dimension_numbers<[1], [0], [0], [1], [0, 0, 1, 1], [], []>} : vector<8x128xbf16>, vector<128x128xbf16>, vector<8x128xf32> -> vector<8x128xf32>
    %59 = arith.addf %56, %58 : vector<8x128xf32>
    %60 = math.tanh %59 : vector<8x128xf32>
    %c7_i32 = arith.constant 7 : i32
    %61 = arith.index_cast %c7_i32 : i32 to index
    %c0_25 = arith.constant 0 : index
    %c0_26 = arith.constant 0 : index
    %62 = vector.load %arg2[%61, %c0_25, %c0_26] : memref<8x8x128xbf16, #tpu.memory_space<vmem>>, vector<1x8x128xbf16>
    %63 = vector.shape_cast %62 : vector<1x8x128xbf16> to vector<8x128xbf16>
    %64 = arith.extf %63 : vector<8x128xbf16> to vector<8x128xf32>
    %65 = arith.truncf %60 : vector<8x128xf32> to vector<8x128xbf16>
    %cst_27 = arith.constant dense<0.000000e+00> : vector<8x128xf32>
    %66 = tpu.matmul %65, %3, %cst_27 {dimension_numbers = #tpu.dot_dimension_numbers<[1], [0], [0], [1], [0, 0, 1, 1], [], []>} : vector<8x128xbf16>, vector<128x128xbf16>, vector<8x128xf32> -> vector<8x128xf32>
    %67 = arith.addf %64, %66 : vector<8x128xf32>
    %68 = math.tanh %67 : vector<8x128xf32>
    %c8_i32 = arith.constant 8 : i32
    %c0_28 = arith.constant 0 : index
    %c0_29 = arith.constant 0 : index
    %69 = vector.load %arg7[%c0_28, %c0_29] : memref<8x128xf32, #tpu.memory_space<vmem>>, vector<8x128xf32>
    tpu.vector_store %arg7[%c0_28, %c0_29], %68 {strides = array<i32>} : memref<8x128xf32, #tpu.memory_space<vmem>>, vector<8x128xf32>,
    %c0_i32_30 = arith.constant 0 : i32
    %70 = arith.cmpi eq, %arg1, %c0_i32_30 : i32
    %71 = arith.extui %70 : i1 to i32
    %c0_i32_31 = arith.constant 0 : i32
    %72 = arith.cmpi ne, %71, %c0_i32_31 : i32
    scf.if %72 {
      %c0_32 = arith.constant 0 : index
      %c0_33 = arith.constant 0 : index
      %73 = vector.load %arg4[%c0_32, %c0_33] : memref<1x128xf32, #tpu.memory_space<vmem>>, vector<1x128xf32>
      %74 = vector.broadcast %73 : vector<1x128xf32> to vector<8x128xf32>
      %75 = arith.mulf %68, %74 : vector<8x128xf32>
      %cst_34 = arith.constant dense<0.000000e+00> : vector<8xf32>
      %76 = vector.multi_reduction <add>, %75, %cst_34 [1] : vector<8x128xf32> to vector<8xf32>
      %77 = vector.shape_cast %76 : vector<8xf32> to vector<8x1xf32>
      %c0_35 = arith.constant 0 : index
      %c0_36 = arith.constant 0 : index
      %78 = memref.load %arg5[%c0_35, %c0_36] : memref<1x1xf32, #tpu.memory_space<smem>>
      %79 = vector.broadcast %78 : f32 to vector<8x1xf32>
      %80 = arith.addf %77, %79 : vector<8x1xf32>
      %81 = arith.negf %80 : vector<8x1xf32>
      %82 = math.exp %81 : vector<8x1xf32>
      %cst_37 = arith.constant 1.000000e+00 : f32
      %83 = vector.broadcast %cst_37 : f32 to vector<8x1xf32>
      %84 = arith.addf %83, %82 : vector<8x1xf32>
      %85 = arith.divf %83, %84 : vector<8x1xf32>
      %86 = vector.shape_cast %85 : vector<8x1xf32> to vector<8x1xf32>
      %87 = vector.broadcast %86 : vector<8x1xf32> to vector<8x128xf32>
      %c0_38 = arith.constant 0 : index
      %c0_39 = arith.constant 0 : index
      %88 = vector.load %arg6[%c0_38, %c0_39] : memref<8x128xf32, #tpu.memory_space<vmem>>, vector<8x128xf32>
      tpu.vector_store %arg6[%c0_38, %c0_39], %87 {strides = array<i32>} : memref<8x128xf32, #tpu.memory_space<vmem>>, vector<8x128xf32>,
    } else {
    }
    return
  }
  func.func @transform_0(%arg0: i32, %arg1: i32) -> (i32, i32, i32) {
    %c0_i32 = arith.constant 0 : i32
    %c0_i32_0 = arith.constant 0 : i32
    return %arg1, %arg0, %c0_i32 : i32, i32, i32
  }
  func.func @transform_1(%arg0: i32, %arg1: i32) -> (i32, i32) {
    %c0_i32 = arith.constant 0 : i32
    %c0_i32_0 = arith.constant 0 : i32
    %c0_i32_1 = arith.constant 0 : i32
    return %c0_i32, %c0_i32_0 : i32, i32
  }
  func.func @transform_2(%arg0: i32, %arg1: i32) -> (i32, i32) {
    %c0_i32 = arith.constant 0 : i32
    %c0_i32_0 = arith.constant 0 : i32
    %c0_i32_1 = arith.constant 0 : i32
    return %c0_i32, %c0_i32_0 : i32, i32
  }
  func.func @transform_3(%arg0: i32, %arg1: i32) -> (i32, i32) {
    %c0_i32 = arith.constant 0 : i32
    %c0_i32_0 = arith.constant 0 : i32
    %c0_i32_1 = arith.constant 0 : i32
    return %c0_i32, %c0_i32_0 : i32, i32
  }
  func.func @transform_4(%arg0: i32, %arg1: i32) -> (i32, i32) {
    %c0_i32 = arith.constant 0 : i32
    %c0_i32_0 = arith.constant 0 : i32
    return %arg0, %c0_i32 : i32, i32
  }
}

</mosaic_0001>

<bundles_post_ra>
// kernel: sentiment_rnn_forward.1
= control target key start
LH: loop header
LB: loop body
LE: loop exit
PB: predicated region body
PF: predicated region fallthrough
CT: control target
= control target key end

     0   :  { %v347_v8 = vmov 0.0|0.0   ;;  %s418_s1 = inlined_call_operand.vmem [shape: bf16[128,128], index: 1, kind: input, shape index: {}]   ;;  %s419_s0 = inlined_call_operand.vmem [shape: bf16[8,8,128], index: 0, kind: input, shape index: {}]   ;;  %s420_s2 = inlined_call_operand.vmem [shape: f32[1,128], index: 2, kind: input, shape index: {}]   ;;  %s421_s3 = inlined_call_operand.<no memory space> [shape: f32[1,1], index: 3, kind: input, shape index: {}]   ;;  %s422_s4 = inlined_call_operand.vmem [shape: f32[8,128], index: 4, kind: output, shape index: {}]  }
   0x1   :  { %v324_v0 = vld [vmem:[%s418_s1 + $0x38] sm:$0xff]  ;;  %v323_v1 = vld [vmem:[%s418_s1 + $0x30] sm:$0xff]  ;;  %v322_v2 = vld [vmem:[%s418_s1 + $0x28] sm:$0xff]  ;;  %v251_v62 = vstv %s421_s3 }
   0x2   :  { %91 = vmatpush.bf16.msra.mxu0 %v324_v0  ;;  %110 = vmatpush.bf16.msra.mxu1 %v324_v0  ;;  %v321_v3 = vld [vmem:[%s418_s1 + $0x20] sm:$0xff]  ;;  %v320_v4 = vld [vmem:[%s418_s1 + $0x18] sm:$0xff]  ;;  %v319_v5 = vld [vmem:[%s418_s1 + $0x10] sm:$0xff] }
   0x3   :  { %129 = vmatpush.bf16.msra.mxu2 %v324_v0  ;;  %148 = vmatpush.bf16.msra.mxu3 %v324_v0  ;;  %v318_v6 = vld [vmem:[%s418_s1 + $0x8] sm:$0xff]  ;;  %v317_v7 = vld [vmem:[%s418_s1] sm:$0xff]  ;;  %v312_v35 = vld [vmem:[%s419_s0 + $0x10] sm:$0xff]  }
   0x4   :  { %v40_v9 = vld [vmem:[%s419_s0] sm:$0xff]   ;;  %v310_v22 = vld [vmem:[%s419_s0 + $0x8] sm:$0xff]   ;;  %v165_v36 = vunpack.c.l.bf16 %v312_v35  ;;  %v184_v42 = vunpack.c.h.bf16 %v312_v35  ;;  %v314_v48 = vld [vmem:[%s419_s0 + $0x18] sm:$0xff]  }
   0x5   :  { %v41_v10 = vunpack.c.l.bf16 %v40_v9  ;;  %v108_v16 = vunpack.c.h.bf16 %v40_v9  ;;  %v127_v23 = vunpack.c.l.bf16 %v310_v22  ;;  %v146_v29 = vunpack.c.h.bf16 %v310_v22  ;;  %v326_v58 = vld [vmem:[%s420_s2] ss:$0 sm:$0xff] }
   0x6   :  { %92 = vmatpush.bf16.msra.mxu0 %v323_v1  ;;  %111 = vmatpush.bf16.msra.mxu1 %v323_v1  ;;  %v203_v49 = vunpack.c.l.bf16 %v314_v48  ;;  %v222_v55 = vunpack.c.h.bf16 %v314_v48 }
   0x7   :  { %130 = vmatpush.bf16.msra.mxu2 %v323_v1  ;;  %149 = vmatpush.bf16.msra.mxu3 %v323_v1 }
   0xa   :  { %93 = vmatpush.bf16.msra.mxu0 %v322_v2  ;;  %112 = vmatpush.bf16.msra.mxu1 %v322_v2 }
   0xb   :  { %131 = vmatpush.bf16.msra.mxu2 %v322_v2  ;;  %150 = vmatpush.bf16.msra.mxu3 %v322_v2 }
   0xe   :  { %94 = vmatpush.bf16.msra.mxu0 %v321_v3  ;;  %113 = vmatpush.bf16.msra.mxu1 %v321_v3 }
   0xf   :  { %132 = vmatpush.bf16.msra.mxu2 %v321_v3  ;;  %151 = vmatpush.bf16.msra.mxu3 %v321_v3 }
  0x12   :  { %95 = vmatpush.bf16.msra.mxu0 %v320_v4  ;;  %114 = vmatpush.bf16.msra.mxu1 %v320_v4 }
  0x13   :  { %133 = vmatpush.bf16.msra.mxu2 %v320_v4  ;;  %152 = vmatpush.bf16.msra.mxu3 %v320_v4 }
  0x16   :  { %96 = vmatpush.bf16.msra.mxu0 %v319_v5  ;;  %115 = vmatpush.bf16.msra.mxu1 %v319_v5 }
  0x17   :  { %134 = vmatpush.bf16.msra.mxu2 %v319_v5  ;;  %153 = vmatpush.bf16.msra.mxu3 %v319_v5 }
  0x1a   :  { %97 = vmatpush.bf16.msra.mxu0 %v318_v6  ;;  %116 = vmatpush.bf16.msra.mxu1 %v318_v6 }
  0x1b   :  { %135 = vmatpush.bf16.msra.mxu2 %v318_v6  ;;  %154 = vmatpush.bf16.msra.mxu3 %v318_v6 }
  0x1e   :  { %98 = vmatpush.bf16.msra.mxu0 %v317_v7  ;;  %117 = vmatpush.bf16.msra.mxu1 %v317_v7 }
  0x1f   :  { %136 = vmatpush.bf16.msra.mxu2 %v317_v7  ;;  %155 = vmatpush.bf16.msra.mxu3 %v317_v7 }
  0x21   :  { %99 = vmatmul.bf16.vlgmr.msra.gmra.mxu0 %v347_v8 }
  0x22   :  { %167 = vmatpush.bf16.msrb.mxu0 %v324_v0  ;;  %186 = vmatpush.bf16.msrb.mxu1 %v324_v0 }
  0x23   :  { %205 = vmatpush.bf16.msrb.mxu2 %v324_v0  ;;  %224 = vmatpush.bf16.msrb.mxu3 %v324_v0 }
  0x26   :  { %168 = vmatpush.bf16.msrb.mxu0 %v323_v1  ;;  %187 = vmatpush.bf16.msrb.mxu1 %v323_v1 }
  0x27   :  { %206 = vmatpush.bf16.msrb.mxu2 %v323_v1  ;;  %225 = vmatpush.bf16.msrb.mxu3 %v323_v1 }
  0x2a   :  { %169 = vmatpush.bf16.msrb.mxu0 %v322_v2  ;;  %188 = vmatpush.bf16.msrb.mxu1 %v322_v2 }
  0x2b   :  { %207 = vmatpush.bf16.msrb.mxu2 %v322_v2  ;;  %226 = vmatpush.bf16.msrb.mxu3 %v322_v2 }
  0x2e   :  { %170 = vmatpush.bf16.msrb.mxu0 %v321_v3  ;;  %189 = vmatpush.bf16.msrb.mxu1 %v321_v3 }
  0x2f   :  { %208 = vmatpush.bf16.msrb.mxu2 %v321_v3  ;;  %227 = vmatpush.bf16.msrb.mxu3 %v321_v3 }
  0x32   :  { %171 = vmatpush.bf16.msrb.mxu0 %v320_v4  ;;  %190 = vmatpush.bf16.msrb.mxu1 %v320_v4 }
  0x33   :  { %209 = vmatpush.bf16.msrb.mxu2 %v320_v4  ;;  %228 = vmatpush.bf16.msrb.mxu3 %v320_v4 }
  0x36   :  { %172 = vmatpush.bf16.msrb.mxu0 %v319_v5  ;;  %191 = vmatpush.bf16.msrb.mxu1 %v319_v5 }
  0x37   :  { %210 = vmatpush.bf16.msrb.mxu2 %v319_v5  ;;  %229 = vmatpush.bf16.msrb.mxu3 %v319_v5 }
  0x3a   :  { %173 = vmatpush.bf16.msrb.mxu0 %v318_v6  ;;  %192 = vmatpush.bf16.msrb.mxu1 %v318_v6 }
  0x3b   :  { %211 = vmatpush.bf16.msrb.mxu2 %v318_v6  ;;  %230 = vmatpush.bf16.msrb.mxu3 %v318_v6 }
  0x3e   :  { %174 = vmatpush.bf16.msrb.mxu0 %v317_v7  ;;  %193 = vmatpush.bf16.msrb.mxu1 %v317_v7 }
  0x3f   :  { %212 = vmatpush.bf16.msrb.mxu2 %v317_v7  ;;  %231 = vmatpush.bf16.msrb.mxu3 %v317_v7 }
  0x9e   :  { %v100_v11 = vpop.f32.mrf.mxu0 }
  0x9f   :  { %v104_v12 = vadd.f32 %v100_v11, %v41_v10 }
  0xa1   :  { %327 = vtanh.f32 %v104_v12 }
  0xa6   :  { %v102_v13 = vpop.f32.mrf.mxu0 }
  0xa7   :  { %v328_v14 = vpop.eup %327 }
  0xa8   :  { %v109_v15 = vpack.c.bf16 %v328_v14, %v328_v14 }
  0xaa   :  { %118 = vmatmul.bf16.vlgmr.msra.gmra.mxu1 %v109_v15 }
 0x127   :  { %v119_v17 = vpop.f32.mrf.mxu1 }
 0x128   :  { %v123_v18 = vadd.f32 %v119_v17, %v108_v16 }
 0x12a   :  { %329 = vtanh.f32 %v123_v18 }
 0x12f   :  { %v121_v19 = vpop.f32.mrf.mxu1 }
 0x130   :  { %v330_v20 = vpop.eup %329 }
 0x131   :  { %v128_v21 = vpack.c.bf16 %v330_v20, %v330_v20 }
 0x133   :  { %137 = vmatmul.bf16.vlgmr.msra.gmra.mxu2 %v128_v21 }
 0x1b6   :  { %v138_v24 = vpop.f32.mrf.mxu2 }
 0x1b7   :  { %v142_v25 = vadd.f32 %v138_v24, %v127_v23 }
 0x1b9   :  { %331 = vtanh.f32 %v142_v25 }
 0x1be   :  { %v140_v26 = vpop.f32.mrf.mxu2 }
 0x1bf   :  { %v332_v27 = vpop.eup %331 }
 0x1c0   :  { %v147_v28 = vpack.c.bf16 %v332_v27, %v332_v27 }
 0x1c2   :  { %156 = vmatmul.bf16.vlgmr.msra.gmra.mxu3 %v147_v28 }
 0x245   :  { %v157_v30 = vpop.f32.mrf.mxu3 }
 0x246   :  { %v161_v31 = vadd.f32 %v157_v30, %v146_v29 }
 0x248   :  { %333 = vtanh.f32 %v161_v31 }
 0x24d   :  { %v159_v32 = vpop.f32.mrf.mxu3 }
 0x24e   :  { %v334_v33 = vpop.eup %333 }
 0x24f   :  { %v166_v34 = vpack.c.bf16 %v334_v33, %v334_v33 }
 0x251   :  { %175 = vmatmul.bf16.vlgmr.msrb.gmra.mxu0 %v166_v34 }
 0x2ce   :  { %v176_v37 = vpop.f32.mrf.mxu0 }
 0x2cf   :  { %v180_v38 = vadd.f32 %v176_v37, %v165_v36 }
 0x2d1   :  { %335 = vtanh.f32 %v180_v38 }
 0x2d6   :  { %v178_v39 = vpop.f32.mrf.mxu0 }
 0x2d7   :  { %v336_v40 = vpop.eup %335 }
 0x2d8   :  { %v185_v41 = vpack.c.bf16 %v336_v40, %v336_v40 }
 0x2da   :  { %194 = vmatmul.bf16.vlgmr.msrb.gmra.mxu1 %v185_v41 }
 0x357   :  { %v195_v43 = vpop.f32.mrf.mxu1 }
 0x358   :  { %v199_v44 = vadd.f32 %v195_v43, %v184_v42 }
 0x35a   :  { %337 = vtanh.f32 %v199_v44 }
 0x35f   :  { %v197_v45 = vpop.f32.mrf.mxu1 }
 0x360   :  { %v338_v46 = vpop.eup %337 }
 0x361   :  { %v204_v47 = vpack.c.bf16 %v338_v46, %v338_v46 }
 0x363   :  { %213 = vmatmul.bf16.vlgmr.msrb.gmra.mxu2 %v204_v47 }
 0x3e6   :  { %v214_v50 = vpop.f32.mrf.mxu2 }
 0x3e7   :  { %v218_v51 = vadd.f32 %v214_v50, %v203_v49 }
 0x3e9   :  { %339 = vtanh.f32 %v218_v51 }
 0x3ee   :  { %v216_v52 = vpop.f32.mrf.mxu2 }
 0x3ef   :  { %v340_v53 = vpop.eup %339 }
 0x3f0   :  { %v223_v54 = vpack.c.bf16 %v340_v53, %v340_v53 }
 0x3f2   :  { %232 = vmatmul.bf16.vlgmr.msrb.gmra.mxu3 %v223_v54 }
 0x475   :  { %v233_v56 = vpop.f32.mrf.mxu3 }
 0x476   :  { %v237_v57 = vadd.f32 %v233_v56, %v222_v55 }
 0x478   :  { %341 = vtanh.f32 %v237_v57 }
 0x47d   :  { %v235_v59 = vpop.f32.mrf.mxu3 }
 0x47e   :  { %v342_v60 = vpop.eup %341 }
 0x47f   :  { %v247_v61 = vmul.f32 %v342_v60, %v326_v58 }
 0x481   :  { %248 = vadd.xlane.f32.xlu0 %v247_v61 }
 0x4f4   :  { %v249_v63 = vpop.xlane.xlu0 %248 }
 0x4f5   :  { %v252_v0 = vadd.f32 %v251_v62, %v249_v63 }
 0x4f7   :  { %v316_v1 = vmul.f32 -1.442695, %v252_v0 }
 0x4f9   :  { %343 = vpow2.f32 %v316_v1 }
 0x4ff   :  { %v344_v2 = vpop.eup %343 }
 0x500   :  { %v256_v3 = vadd.f32 1.0, %v344_v2 }
 0x502   :  { %345 = vrcp.f32 %v256_v3  ;;  %v268_v7 = vand.u32 2147483648, %v256_v3  ;;  %v266_v9 = vand.u32 2147483647, %v256_v3  ;;  %vm262_vm1 = vweird.f32 %v256_v3 }
 0x504   :  { %v269_v11 = vor.u32 1.1754944e-38, %v268_v7  ;;  %vm267_vm3 = vcmp.eq.f32.partialorder %v266_v9, 8.507059e+37 }
 0x508   :  { %v346_v4 = vpop.eup %345 }
 0x509   :  { %v258_v5 = vmul.f32 %v346_v4, %v256_v3  ;;  %vm263_vm0 = vweird.f32 %v346_v4 }
 0x50a   :  { %vm264_vm2 = vmor %vm262_vm1, %vm263_vm0 }
 0x50b   :  { %v259_v6 = vsub.f32 1.0, %v258_v5 }
 0x50d   :  { %v260_v8 = vmul.f32 %v346_v4, %v259_v6 }
 0x50f   :  { %v261_v10 = vadd.f32 %v346_v4, %v260_v8 }
 0x511   :  { %v265_v12 = vsel %vm264_vm2, %v346_v4, %v261_v10 }
 0x512   :  { %v270_v13 = vsel %vm267_vm3, %v269_v11, %v265_v12 }
 0x513   :  { %272 = vst [vmem:[%s422_s4] sm:$0xff] %v270_v13 }

</bundles_post_ra>
